<compile_context>
chip_gen: v7x
topology: tpu7x:2x2x1
jax: 0.10.0
libtpu: 0.0.40
codegen_flags: <defaults>
</compile_context>

<pallas_src>
import jax
import jax.numpy as jnp
from jax.experimental import pallas as pl
from jax.experimental.pallas import tpu as pltpu


# ----------------------------- hyper-parameters ------------------------------
BATCH = 2
SEQ_LEN = 8
IN_CHANNELS = 4
HIDDEN_CHANNELS = 32          # 4*H = 128 -> gate matmul output is exactly one lane tile
OUT_CHANNELS = 4
NUM_LAYERS = 1                # see TODO above

# gate-parameter slab layout (8-aligned row starts), lane width = 4*H
_ROW_IH = 0                                   # W_ih^T : (Cin, 4H)
_ROW_HH = 8                                   # W_hh^T : (H,   4H)
_ROW_B = _ROW_HH + HIDDEN_CHANNELS            # b_ih + b_hh : (1, 4H)
_GSLAB_ROWS = _ROW_B + 8

# head-parameter slab layout, lane width = out_channels
_ROW_WL = 0                                   # W_lin^T : (2H, out)
_ROW_BL = 2 * HIDDEN_CHANNELS                 # b_lin   : (1, out)
_HSLAB_ROWS = _ROW_BL + 8


# ------------------------------ in-kernel math --------------------------------
def _sigmoid(x):
    # explicit form: jnp.exp lowers to the EUP, reciprocal/add on the VPU
    return 1.0 / (1.0 + jnp.exp(-x))


def _make_kernel(batch, seq_len):
    H = HIDDEN_CHANNELS
    Cin = IN_CHANNELS

    def kernel(x_ref, gslab_ref, hslab_ref, out_ref):
        # x_ref: (T*B, Cin), time-major rows (row = t*B + b)
        w_ih = gslab_ref[_ROW_IH:_ROW_IH + Cin, :]         # (Cin, 4H)
        w_hh = gslab_ref[_ROW_HH:_ROW_HH + H, :]           # (H,   4H)
        b_g = gslab_ref[_ROW_B:_ROW_B + 1, :]              # (1,   4H)

        # Whole-batch, whole-sequence input projection in a single MXU matmul,
        # with both LSTM biases folded in exactly once.
        gx = jnp.dot(x_ref[...], w_ih, preferred_element_type=jnp.float32) + b_g

        h = jnp.zeros((batch, H), jnp.float32)
        c = jnp.zeros((batch, H), jnp.float32)

        # The recurrence is inherently serial; T is tiny, so static-unroll it so
        # the scheduler sees the whole dependence chain.
        for t in range(seq_len):
            gates = gx[t * batch:(t + 1) * batch, :] + jnp.dot(
                h, w_hh, preferred_element_type=jnp.float32)       # (B, 4H)
            # torch gate order: i, f, g, o
            i = _sigmoid(gates[:, 0:H])
            f = _sigmoid(gates[:, H:2 * H])
            g = jnp.tanh(gates[:, 2 * H:3 * H])
            o = _sigmoid(gates[:, 3 * H:4 * H])
            c = f * c + i * g
            h = o * jnp.tanh(c)

        # torch: cat((h_n, c_n), dim=2).transpose(0,1).reshape(B, 2*H)  -> [h, c]
        hc = jnp.concatenate([h, c], axis=-1)                       # (B, 2H)
        w_lin = hslab_ref[_ROW_WL:_ROW_WL + 2 * H, :]               # (2H, out)
        b_lin = hslab_ref[_ROW_BL:_ROW_BL + 1, :]                   # (1,  out)
        out_ref[...] = (
            jnp.dot(hc, w_lin, preferred_element_type=jnp.float32) + b_lin
        )

    return kernel


# --------------------------------- wrapper ------------------------------------
def lstm_forward(x_btc, params):
    """x_btc: (B, T, in_channels) float32 — the already-stacked `signatures`."""
    B, T, Cin = x_btc.shape
    H = HIDDEN_CHANNELS

    # Time-major flatten so a single (T*B, Cin) @ (Cin, 4H) matmul covers every
    # (batch, time) input projection, and step t's rows are a contiguous slice.
    x_tm = jnp.transpose(x_btc, (1, 0, 2)).reshape(T * B, Cin).astype(jnp.float32)

    # Pack gate parameters into one lane-aligned slab (fewer inputs / DMAs).
    gslab = jnp.zeros((_GSLAB_ROWS, 4 * H), jnp.float32)
    gslab = gslab.at[_ROW_IH:_ROW_IH + Cin, :].set(params["w_ih"])
    gslab = gslab.at[_ROW_HH:_ROW_HH + H, :].set(params["w_hh"])
    gslab = gslab.at[_ROW_B, :].set(params["b"][0])

    # Pack the final Linear into a second slab.
    hslab = jnp.zeros((_HSLAB_ROWS, OUT_CHANNELS), jnp.float32)
    hslab = hslab.at[_ROW_WL:_ROW_WL + 2 * H, :].set(params["w_lin"])
    hslab = hslab.at[_ROW_BL, :].set(params["b_lin"][0])

    # Single invocation: whole problem (params ~20 KB + activations ~10 KB) fits
    # comfortably in VMEM on v5e/v6e/v7x; no pipelining needed.
    return pl.pallas_call(
        _make_kernel(B, T),
        out_shape=jax.ShapeDtypeStruct((B, OUT_CHANNELS), jnp.float32),
        in_specs=[
            pl.BlockSpec(memory_space=pltpu.MemorySpace.VMEM),
            pl.BlockSpec(memory_space=pltpu.MemorySpace.VMEM),
            pl.BlockSpec(memory_space=pltpu.MemorySpace.VMEM),
        ],
        out_specs=pl.BlockSpec(memory_space=pltpu.MemorySpace.VMEM),
    )(x_tm, gslab, hslab)


# ------------------------------ parameter init --------------------------------
def init_params(key):
    """torch-layout LSTM/Linear params, pre-transposed to kernel layout."""
    H = HIDDEN_CHANNELS
    ks = jax.random.split(key, 6)

    def u(k, shape, bound):
        return jax.random.uniform(k, shape, jnp.float32, -bound, bound)

    b_lstm = 1.0 / (H ** 0.5)                 # torch nn.LSTM default init bound
    w_ih_t = u(ks[0], (4 * H, IN_CHANNELS), b_lstm)   # gate order [i, f, g, o]
    w_hh_t = u(ks[1], (4 * H, H), b_lstm)
    b_ih = u(ks[2], (4 * H,), b_lstm)
    b_hh = u(ks[3], (4 * H,), b_lstm)

    b_lin_bound = 1.0 / ((2 * H) ** 0.5)      # torch nn.Linear default init bound
    w_lin_t = u(ks[4], (OUT_CHANNELS, 2 * H), b_lin_bound)
    b_lin = u(ks[5], (OUT_CHANNELS,), b_lin_bound)

    return {
        "w_ih": w_ih_t.T,                                  # (Cin, 4H)
        "w_hh": w_hh_t.T,                                  # (H,   4H)
        "b": (b_ih + b_hh).reshape(1, 4 * H),              # biases folded once
        "w_lin": w_lin_t.T,                                # (2H, out)
        "b_lin": b_lin.reshape(1, OUT_CHANNELS),
    }


# ------------------------------ pure-JAX reference ----------------------------
def reference_forward(x_btc, p):
    B, T, _ = x_btc.shape
    H = HIDDEN_CHANNELS
    h = jnp.zeros((B, H), jnp.float32)
    c = jnp.zeros((B, H), jnp.float32)
    for t in range(T):
        gates = x_btc[:, t, :] @ p["w_ih"] + h @ p["w_hh"] + p["b"]
        i = jax.nn.sigmoid(gates[:, 0:H])
        f = jax.nn.sigmoid(gates[:, H:2 * H])
        g = jnp.tanh(gates[:, 2 * H:3 * H])
        o = jax.nn.sigmoid(gates[:, 3 * H:4 * H])
        c = f * c + i * g
        h = o * jnp.tanh(c)
    hc = jnp.concatenate([h, c], axis=-1)                  # (B, 2H)
    return hc @ p["w_lin"] + p["b_lin"]


# ----------------------------------- main --------------------------------------
if __name__ == "__main__":
    key = jax.random.PRNGKey(0)
    k_x, k_p = jax.random.split(key)

    # Mimic the torch forward's input: a list of SEQ_LEN signature tensors of
    # shape (B, in_channels), stacked on dim=1 -> (B, T, in_channels).
    sigs = [
        jax.random.normal(jax.random.fold_in(k_x, t), (BATCH, IN_CHANNELS), jnp.float32)
        for t in range(SEQ_LEN)
    ]
    x = jnp.stack(sigs, axis=1)                            # (B, T, Cin)

    params = init_params(k_p)

    out = jax.block_until_ready(lstm_forward(x, params))
    ref = jax.block_until_ready(reference_forward(x, params))

    assert out.shape == (BATCH, OUT_CHANNELS), out.shape
    assert jnp.allclose(out, ref, atol=1e-4, rtol=1e-4), (out, ref)

    print("KERNEL_OK")
</pallas_src>

<mosaic_0001>
module attributes {stable_mosaic.version = 11 : i64} {
  func.func @kernel(%arg0: memref<16x4xf32, #tpu.memory_space<vmem>>, %arg1: memref<48x128xf32, #tpu.memory_space<vmem>>, %arg2: memref<72x4xf32, #tpu.memory_space<vmem>>, %arg3: memref<2x4xf32, #tpu.memory_space<vmem>>) attributes {dimension_semantics = [], scalar_prefetch = 0 : i64, scratch_operands = 0 : i64, tpu.core_type = #tpu.core_type<tc>} {
    %c0 = arith.constant 0 : index
    %c0_0 = arith.constant 0 : index
    %0 = vector.load %arg1[%c0, %c0_0] : memref<48x128xf32, #tpu.memory_space<vmem>>, vector<4x128xf32>
    %c8 = arith.constant 8 : index
    %c0_1 = arith.constant 0 : index
    %1 = vector.load %arg1[%c8, %c0_1] : memref<48x128xf32, #tpu.memory_space<vmem>>, vector<32x128xf32>
    %c40 = arith.constant 40 : index
    %c0_2 = arith.constant 0 : index
    %2 = vector.load %arg1[%c40, %c0_2] : memref<48x128xf32, #tpu.memory_space<vmem>>, vector<1x128xf32>
    %c0_3 = arith.constant 0 : index
    %c0_4 = arith.constant 0 : index
    %3 = vector.load %arg0[%c0_3, %c0_4] : memref<16x4xf32, #tpu.memory_space<vmem>>, vector<16x4xf32>
    %cst = arith.constant dense<0.000000e+00> : vector<16x128xf32>
    %4 = tpu.matmul %3, %0, %cst {dimension_numbers = #tpu.dot_dimension_numbers<[1], [0], [0], [1], [0, 0, 1, 1], [], []>} : vector<16x4xf32>, vector<4x128xf32>, vector<16x128xf32> -> vector<16x128xf32>
    %5 = vector.broadcast %2 : vector<1x128xf32> to vector<16x128xf32>
    %6 = arith.addf %4, %5 : vector<16x128xf32>
    %cst_5 = arith.constant 0.000000e+00 : f32
    %7 = vector.broadcast %cst_5 : f32 to vector<2x32xf32>
    %cst_6 = arith.constant 0.000000e+00 : f32
    %8 = vector.broadcast %cst_6 : f32 to vector<2x32xf32>
    %9 = vector.extract_strided_slice %6 {offsets = [0, 0], sizes = [2, 128], strides = [1, 1]} : vector<16x128xf32> to vector<2x128xf32>
    %cst_7 = arith.constant dense<0.000000e+00> : vector<2x128xf32>
    %10 = tpu.matmul %7, %1, %cst_7 {dimension_numbers = #tpu.dot_dimension_numbers<[1], [0], [0], [1], [0, 0, 1, 1], [], []>} : vector<2x32xf32>, vector<32x128xf32>, vector<2x128xf32> -> vector<2x128xf32>
    %11 = arith.addf %9, %10 : vector<2x128xf32>
    %12 = vector.extract_strided_slice %11 {offsets = [0, 0], sizes = [2, 32], strides = [1, 1]} : vector<2x128xf32> to vector<2x32xf32>
    %cst_8 = arith.constant 0.000000e+00 : f32
    %13 = vector.broadcast %cst_8 : f32 to vector<2x32xf32>
    %14 = arith.subf %13, %12 : vector<2x32xf32>
    %15 = math.exp %14 : vector<2x32xf32>
    %cst_9 = arith.constant 1.000000e+00 : f32
    %16 = vector.broadcast %cst_9 : f32 to vector<2x32xf32>
    %17 = arith.addf %16, %15 : vector<2x32xf32>
    %cst_10 = arith.constant 1.000000e+00 : f32
    %18 = vector.broadcast %cst_10 : f32 to vector<2x32xf32>
    %19 = arith.divf %18, %17 : vector<2x32xf32>
    %20 = vector.extract_strided_slice %11 {offsets = [0, 32], sizes = [2, 32], strides = [1, 1]} : vector<2x128xf32> to vector<2x32xf32>
    %cst_11 = arith.constant 0.000000e+00 : f32
    %21 = vector.broadcast %cst_11 : f32 to vector<2x32xf32>
    %22 = arith.subf %21, %20 : vector<2x32xf32>
    %23 = math.exp %22 : vector<2x32xf32>
    %cst_12 = arith.constant 1.000000e+00 : f32
    %24 = vector.broadcast %cst_12 : f32 to vector<2x32xf32>
    %25 = arith.addf %24, %23 : vector<2x32xf32>
    %cst_13 = arith.constant 1.000000e+00 : f32
    %26 = vector.broadcast %cst_13 : f32 to vector<2x32xf32>
    %27 = arith.divf %26, %25 : vector<2x32xf32>
    %28 = vector.extract_strided_slice %11 {offsets = [0, 64], sizes = [2, 32], strides = [1, 1]} : vector<2x128xf32> to vector<2x32xf32>
    %29 = math.tanh %28 : vector<2x32xf32>
    %30 = vector.extract_strided_slice %11 {offsets = [0, 96], sizes = [2, 32], strides = [1, 1]} : vector<2x128xf32> to vector<2x32xf32>
    %cst_14 = arith.constant 0.000000e+00 : f32
    %31 = vector.broadcast %cst_14 : f32 to vector<2x32xf32>
    %32 = arith.subf %31, %30 : vector<2x32xf32>
    %33 = math.exp %32 : vector<2x32xf32>
    %cst_15 = arith.constant 1.000000e+00 : f32
    %34 = vector.broadcast %cst_15 : f32 to vector<2x32xf32>
    %35 = arith.addf %34, %33 : vector<2x32xf32>
    %cst_16 = arith.constant 1.000000e+00 : f32
    %36 = vector.broadcast %cst_16 : f32 to vector<2x32xf32>
    %37 = arith.divf %36, %35 : vector<2x32xf32>
    %38 = arith.mulf %27, %8 : vector<2x32xf32>
    %39 = arith.mulf %19, %29 : vector<2x32xf32>
    %40 = arith.addf %38, %39 : vector<2x32xf32>
    %41 = math.tanh %40 : vector<2x32xf32>
    %42 = arith.mulf %37, %41 : vector<2x32xf32>
    %43 = vector.extract_strided_slice %6 {offsets = [2, 0], sizes = [2, 128], strides = [1, 1]} : vector<16x128xf32> to vector<2x128xf32>
    %cst_17 = arith.constant dense<0.000000e+00> : vector<2x128xf32>
    %44 = tpu.matmul %42, %1, %cst_17 {dimension_numbers = #tpu.dot_dimension_numbers<[1], [0], [0], [1], [0, 0, 1, 1], [], []>} : vector<2x32xf32>, vector<32x128xf32>, vector<2x128xf32> -> vector<2x128xf32>
    %45 = arith.addf %43, %44 : vector<2x128xf32>
    %46 = vector.extract_strided_slice %45 {offsets = [0, 0], sizes = [2, 32], strides = [1, 1]} : vector<2x128xf32> to vector<2x32xf32>
    %cst_18 = arith.constant 0.000000e+00 : f32
    %47 = vector.broadcast %cst_18 : f32 to vector<2x32xf32>
    %48 = arith.subf %47, %46 : vector<2x32xf32>
    %49 = math.exp %48 : vector<2x32xf32>
    %cst_19 = arith.constant 1.000000e+00 : f32
    %50 = vector.broadcast %cst_19 : f32 to vector<2x32xf32>
    %51 = arith.addf %50, %49 : vector<2x32xf32>
    %cst_20 = arith.constant 1.000000e+00 : f32
    %52 = vector.broadcast %cst_20 : f32 to vector<2x32xf32>
    %53 = arith.divf %52, %51 : vector<2x32xf32>
    %54 = vector.extract_strided_slice %45 {offsets = [0, 32], sizes = [2, 32], strides = [1, 1]} : vector<2x128xf32> to vector<2x32xf32>
    %cst_21 = arith.constant 0.000000e+00 : f32
    %55 = vector.broadcast %cst_21 : f32 to vector<2x32xf32>
    %56 = arith.subf %55, %54 : vector<2x32xf32>
    %57 = math.exp %56 : vector<2x32xf32>
    %cst_22 = arith.constant 1.000000e+00 : f32
    %58 = vector.broadcast %cst_22 : f32 to vector<2x32xf32>
    %59 = arith.addf %58, %57 : vector<2x32xf32>
    %cst_23 = arith.constant 1.000000e+00 : f32
    %60 = vector.broadcast %cst_23 : f32 to vector<2x32xf32>
    %61 = arith.divf %60, %59 : vector<2x32xf32>
    %62 = vector.extract_strided_slice %45 {offsets = [0, 64], sizes = [2, 32], strides = [1, 1]} : vector<2x128xf32> to vector<2x32xf32>
    %63 = math.tanh %62 : vector<2x32xf32>
    %64 = vector.extract_strided_slice %45 {offsets = [0, 96], sizes = [2, 32], strides = [1, 1]} : vector<2x128xf32> to vector<2x32xf32>
    %cst_24 = arith.constant 0.000000e+00 : f32
    %65 = vector.broadcast %cst_24 : f32 to vector<2x32xf32>
    %66 = arith.subf %65, %64 : vector<2x32xf32>
    %67 = math.exp %66 : vector<2x32xf32>
    %cst_25 = arith.constant 1.000000e+00 : f32
    %68 = vector.broadcast %cst_25 : f32 to vector<2x32xf32>
    %69 = arith.addf %68, %67 : vector<2x32xf32>
    %cst_26 = arith.constant 1.000000e+00 : f32
    %70 = vector.broadcast %cst_26 : f32 to vector<2x32xf32>
    %71 = arith.divf %70, %69 : vector<2x32xf32>
    %72 = arith.mulf %61, %40 : vector<2x32xf32>
    %73 = arith.mulf %53, %63 : vector<2x32xf32>
    %74 = arith.addf %72, %73 : vector<2x32xf32>
    %75 = math.tanh %74 : vector<2x32xf32>
    %76 = arith.mulf %71, %75 : vector<2x32xf32>
    %77 = vector.extract_strided_slice %6 {offsets = [4, 0], sizes = [2, 128], strides = [1, 1]} : vector<16x128xf32> to vector<2x128xf32>
    %cst_27 = arith.constant dense<0.000000e+00> : vector<2x128xf32>
    %78 = tpu.matmul %76, %1, %cst_27 {dimension_numbers = #tpu.dot_dimension_numbers<[1], [0], [0], [1], [0, 0, 1, 1], [], []>} : vector<2x32xf32>, vector<32x128xf32>, vector<2x128xf32> -> vector<2x128xf32>
    %79 = arith.addf %77, %78 : vector<2x128xf32>
    %80 = vector.extract_strided_slice %79 {offsets = [0, 0], sizes = [2, 32], strides = [1, 1]} : vector<2x128xf32> to vector<2x32xf32>
    %cst_28 = arith.constant 0.000000e+00 : f32
    %81 = vector.broadcast %cst_28 : f32 to vector<2x32xf32>
    %82 = arith.subf %81, %80 : vector<2x32xf32>
    %83 = math.exp %82 : vector<2x32xf32>
    %cst_29 = arith.constant 1.000000e+00 : f32
    %84 = vector.broadcast %cst_29 : f32 to vector<2x32xf32>
    %85 = arith.addf %84, %83 : vector<2x32xf32>
    %cst_30 = arith.constant 1.000000e+00 : f32
    %86 = vector.broadcast %cst_30 : f32 to vector<2x32xf32>
    %87 = arith.divf %86, %85 : vector<2x32xf32>
    %88 = vector.extract_strided_slice %79 {offsets = [0, 32], sizes = [2, 32], strides = [1, 1]} : vector<2x128xf32> to vector<2x32xf32>
    %cst_31 = arith.constant 0.000000e+00 : f32
    %89 = vector.broadcast %cst_31 : f32 to vector<2x32xf32>
    %90 = arith.subf %89, %88 : vector<2x32xf32>
    %91 = math.exp %90 : vector<2x32xf32>
    %cst_32 = arith.constant 1.000000e+00 : f32
    %92 = vector.broadcast %cst_32 : f32 to vector<2x32xf32>
    %93 = arith.addf %92, %91 : vector<2x32xf32>
    %cst_33 = arith.constant 1.000000e+00 : f32
    %94 = vector.broadcast %cst_33 : f32 to vector<2x32xf32>
    %95 = arith.divf %94, %93 : vector<2x32xf32>
    %96 = vector.extract_strided_slice %79 {offsets = [0, 64], sizes = [2, 32], strides = [1, 1]} : vector<2x128xf32> to vector<2x32xf32>
    %97 = math.tanh %96 : vector<2x32xf32>
    %98 = vector.extract_strided_slice %79 {offsets = [0, 96], sizes = [2, 32], strides = [1, 1]} : vector<2x128xf32> to vector<2x32xf32>
    %cst_34 = arith.constant 0.000000e+00 : f32
    %99 = vector.broadcast %cst_34 : f32 to vector<2x32xf32>
    %100 = arith.subf %99, %98 : vector<2x32xf32>
    %101 = math.exp %100 : vector<2x32xf32>
    %cst_35 = arith.constant 1.000000e+00 : f32
    %102 = vector.broadcast %cst_35 : f32 to vector<2x32xf32>
    %103 = arith.addf %102, %101 : vector<2x32xf32>
    %cst_36 = arith.constant 1.000000e+00 : f32
    %104 = vector.broadcast %cst_36 : f32 to vector<2x32xf32>
    %105 = arith.divf %104, %103 : vector<2x32xf32>
    %106 = arith.mulf %95, %74 : vector<2x32xf32>
    %107 = arith.mulf %87, %97 : vector<2x32xf32>
    %108 = arith.addf %106, %107 : vector<2x32xf32>
    %109 = math.tanh %108 : vector<2x32xf32>
    %110 = arith.mulf %105, %109 : vector<2x32xf32>
    %111 = vector.extract_strided_slice %6 {offsets = [6, 0], sizes = [2, 128], strides = [1, 1]} : vector<16x128xf32> to vector<2x128xf32>
    %cst_37 = arith.constant dense<0.000000e+00> : vector<2x128xf32>
    %112 = tpu.matmul %110, %1, %cst_37 {dimension_numbers = #tpu.dot_dimension_numbers<[1], [0], [0], [1], [0, 0, 1, 1], [], []>} : vector<2x32xf32>, vector<32x128xf32>, vector<2x128xf32> -> vector<2x128xf32>
    %113 = arith.addf %111, %112 : vector<2x128xf32>
    %114 = vector.extract_strided_slice %113 {offsets = [0, 0], sizes = [2, 32], strides = [1, 1]} : vector<2x128xf32> to vector<2x32xf32>
    %cst_38 = arith.constant 0.000000e+00 : f32
    %115 = vector.broadcast %cst_38 : f32 to vector<2x32xf32>
    %116 = arith.subf %115, %114 : vector<2x32xf32>
    %117 = math.exp %116 : vector<2x32xf32>
    %cst_39 = arith.constant 1.000000e+00 : f32
    %118 = vector.broadcast %cst_39 : f32 to vector<2x32xf32>
    %119 = arith.addf %118, %117 : vector<2x32xf32>
    %cst_40 = arith.constant 1.000000e+00 : f32
    %120 = vector.broadcast %cst_40 : f32 to vector<2x32xf32>
    %121 = arith.divf %120, %119 : vector<2x32xf32>
    %122 = vector.extract_strided_slice %113 {offsets = [0, 32], sizes = [2, 32], strides = [1, 1]} : vector<2x128xf32> to vector<2x32xf32>
    %cst_41 = arith.constant 0.000000e+00 : f32
    %123 = vector.broadcast %cst_41 : f32 to vector<2x32xf32>
    %124 = arith.subf %123, %122 : vector<2x32xf32>
    %125 = math.exp %124 : vector<2x32xf32>
    %cst_42 = arith.constant 1.000000e+00 : f32
    %126 = vector.broadcast %cst_42 : f32 to vector<2x32xf32>
    %127 = arith.addf %126, %125 : vector<2x32xf32>
    %cst_43 = arith.constant 1.000000e+00 : f32
    %128 = vector.broadcast %cst_43 : f32 to vector<2x32xf32>
    %129 = arith.divf %128, %127 : vector<2x32xf32>
    %130 = vector.extract_strided_slice %113 {offsets = [0, 64], sizes = [2, 32], strides = [1, 1]} : vector<2x128xf32> to vector<2x32xf32>
    %131 = math.tanh %130 : vector<2x32xf32>
    %132 = vector.extract_strided_slice %113 {offsets = [0, 96], sizes = [2, 32], strides = [1, 1]} : vector<2x128xf32> to vector<2x32xf32>
    %cst_44 = arith.constant 0.000000e+00 : f32
    %133 = vector.broadcast %cst_44 : f32 to vector<2x32xf32>
    %134 = arith.subf %133, %132 : vector<2x32xf32>
    %135 = math.exp %134 : vector<2x32xf32>
    %cst_45 = arith.constant 1.000000e+00 : f32
    %136 = vector.broadcast %cst_45 : f32 to vector<2x32xf32>
    %137 = arith.addf %136, %135 : vector<2x32xf32>
    %cst_46 = arith.constant 1.000000e+00 : f32
    %138 = vector.broadcast %cst_46 : f32 to vector<2x32xf32>
    %139 = arith.divf %138, %137 : vector<2x32xf32>
    %140 = arith.mulf %129, %108 : vector<2x32xf32>
    %141 = arith.mulf %121, %131 : vector<2x32xf32>
    %142 = arith.addf %140, %141 : vector<2x32xf32>
    %143 = math.tanh %142 : vector<2x32xf32>
    %144 = arith.mulf %139, %143 : vector<2x32xf32>
    %145 = vector.extract_strided_slice %6 {offsets = [8, 0], sizes = [2, 128], strides = [1, 1]} : vector<16x128xf32> to vector<2x128xf32>
    %cst_47 = arith.constant dense<0.000000e+00> : vector<2x128xf32>
    %146 = tpu.matmul %144, %1, %cst_47 {dimension_numbers = #tpu.dot_dimension_numbers<[1], [0], [0], [1], [0, 0, 1, 1], [], []>} : vector<2x32xf32>, vector<32x128xf32>, vector<2x128xf32> -> vector<2x128xf32>
    %147 = arith.addf %145, %146 : vector<2x128xf32>
    %148 = vector.extract_strided_slice %147 {offsets = [0, 0], sizes = [2, 32], strides = [1, 1]} : vector<2x128xf32> to vector<2x32xf32>
    %cst_48 = arith.constant 0.000000e+00 : f32
    %149 = vector.broadcast %cst_48 : f32 to vector<2x32xf32>
    %150 = arith.subf %149, %148 : vector<2x32xf32>
    %151 = math.exp %150 : vector<2x32xf32>
    %cst_49 = arith.constant 1.000000e+00 : f32
    %152 = vector.broadcast %cst_49 : f32 to vector<2x32xf32>
    %153 = arith.addf %152, %151 : vector<2x32xf32>
    %cst_50 = arith.constant 1.000000e+00 : f32
    %154 = vector.broadcast %cst_50 : f32 to vector<2x32xf32>
    %155 = arith.divf %154, %153 : vector<2x32xf32>
    %156 = vector.extract_strided_slice %147 {offsets = [0, 32], sizes = [2, 32], strides = [1, 1]} : vector<2x128xf32> to vector<2x32xf32>
    %cst_51 = arith.constant 0.000000e+00 : f32
    %157 = vector.broadcast %cst_51 : f32 to vector<2x32xf32>
    %158 = arith.subf %157, %156 : vector<2x32xf32>
    %159 = math.exp %158 : vector<2x32xf32>
    %cst_52 = arith.constant 1.000000e+00 : f32
    %160 = vector.broadcast %cst_52 : f32 to vector<2x32xf32>
    %161 = arith.addf %160, %159 : vector<2x32xf32>
    %cst_53 = arith.constant 1.000000e+00 : f32
    %162 = vector.broadcast %cst_53 : f32 to vector<2x32xf32>
    %163 = arith.divf %162, %161 : vector<2x32xf32>
    %164 = vector.extract_strided_slice %147 {offsets = [0, 64], sizes = [2, 32], strides = [1, 1]} : vector<2x128xf32> to vector<2x32xf32>
    %165 = math.tanh %164 : vector<2x32xf32>
    %166 = vector.extract_strided_slice %147 {offsets = [0, 96], sizes = [2, 32], strides = [1, 1]} : vector<2x128xf32> to vector<2x32xf32>
    %cst_54 = arith.constant 0.000000e+00 : f32
    %167 = vector.broadcast %cst_54 : f32 to vector<2x32xf32>
    %168 = arith.subf %167, %166 : vector<2x32xf32>
    %169 = math.exp %168 : vector<2x32xf32>
    %cst_55 = arith.constant 1.000000e+00 : f32
    %170 = vector.broadcast %cst_55 : f32 to vector<2x32xf32>
    %171 = arith.addf %170, %169 : vector<2x32xf32>
    %cst_56 = arith.constant 1.000000e+00 : f32
    %172 = vector.broadcast %cst_56 : f32 to vector<2x32xf32>
    %173 = arith.divf %172, %171 : vector<2x32xf32>
    %174 = arith.mulf %163, %142 : vector<2x32xf32>
    %175 = arith.mulf %155, %165 : vector<2x32xf32>
    %176 = arith.addf %174, %175 : vector<2x32xf32>
    %177 = math.tanh %176 : vector<2x32xf32>
    %178 = arith.mulf %173, %177 : vector<2x32xf32>
    %179 = vector.extract_strided_slice %6 {offsets = [10, 0], sizes = [2, 128], strides = [1, 1]} : vector<16x128xf32> to vector<2x128xf32>
    %cst_57 = arith.constant dense<0.000000e+00> : vector<2x128xf32>
    %180 = tpu.matmul %178, %1, %cst_57 {dimension_numbers = #tpu.dot_dimension_numbers<[1], [0], [0], [1], [0, 0, 1, 1], [], []>} : vector<2x32xf32>, vector<32x128xf32>, vector<2x128xf32> -> vector<2x128xf32>
    %181 = arith.addf %179, %180 : vector<2x128xf32>
    %182 = vector.extract_strided_slice %181 {offsets = [0, 0], sizes = [2, 32], strides = [1, 1]} : vector<2x128xf32> to vector<2x32xf32>
    %cst_58 = arith.constant 0.000000e+00 : f32
    %183 = vector.broadcast %cst_58 : f32 to vector<2x32xf32>
    %184 = arith.subf %183, %182 : vector<2x32xf32>
    %185 = math.exp %184 : vector<2x32xf32>
    %cst_59 = arith.constant 1.000000e+00 : f32
    %186 = vector.broadcast %cst_59 : f32 to vector<2x32xf32>
    %187 = arith.addf %186, %185 : vector<2x32xf32>
    %cst_60 = arith.constant 1.000000e+00 : f32
    %188 = vector.broadcast %cst_60 : f32 to vector<2x32xf32>
    %189 = arith.divf %188, %187 : vector<2x32xf32>
    %190 = vector.extract_strided_slice %181 {offsets = [0, 32], sizes = [2, 32], strides = [1, 1]} : vector<2x128xf32> to vector<2x32xf32>
    %cst_61 = arith.constant 0.000000e+00 : f32
    %191 = vector.broadcast %cst_61 : f32 to vector<2x32xf32>
    %192 = arith.subf %191, %190 : vector<2x32xf32>
    %193 = math.exp %192 : vector<2x32xf32>
    %cst_62 = arith.constant 1.000000e+00 : f32
    %194 = vector.broadcast %cst_62 : f32 to vector<2x32xf32>
    %195 = arith.addf %194, %193 : vector<2x32xf32>
    %cst_63 = arith.constant 1.000000e+00 : f32
    %196 = vector.broadcast %cst_63 : f32 to vector<2x32xf32>
    %197 = arith.divf %196, %195 : vector<2x32xf32>
    %198 = vector.extract_strided_slice %181 {offsets = [0, 64], sizes = [2, 32], strides = [1, 1]} : vector<2x128xf32> to vector<2x32xf32>
    %199 = math.tanh %198 : vector<2x32xf32>
    %200 = vector.extract_strided_slice %181 {offsets = [0, 96], sizes = [2, 32], strides = [1, 1]} : vector<2x128xf32> to vector<2x32xf32>
    %cst_64 = arith.constant 0.000000e+00 : f32
    %201 = vector.broadcast %cst_64 : f32 to vector<2x32xf32>
    %202 = arith.subf %201, %200 : vector<2x32xf32>
    %203 = math.exp %202 : vector<2x32xf32>
    %cst_65 = arith.constant 1.000000e+00 : f32
    %204 = vector.broadcast %cst_65 : f32 to vector<2x32xf32>
    %205 = arith.addf %204, %203 : vector<2x32xf32>
    %cst_66 = arith.constant 1.000000e+00 : f32
    %206 = vector.broadcast %cst_66 : f32 to vector<2x32xf32>
    %207 = arith.divf %206, %205 : vector<2x32xf32>
    %208 = arith.mulf %197, %176 : vector<2x32xf32>
    %209 = arith.mulf %189, %199 : vector<2x32xf32>
    %210 = arith.addf %208, %209 : vector<2x32xf32>
    %211 = math.tanh %210 : vector<2x32xf32>
    %212 = arith.mulf %207, %211 : vector<2x32xf32>
    %213 = vector.extract_strided_slice %6 {offsets = [12, 0], sizes = [2, 128], strides = [1, 1]} : vector<16x128xf32> to vector<2x128xf32>
    %cst_67 = arith.constant dense<0.000000e+00> : vector<2x128xf32>
    %214 = tpu.matmul %212, %1, %cst_67 {dimension_numbers = #tpu.dot_dimension_numbers<[1], [0], [0], [1], [0, 0, 1, 1], [], []>} : vector<2x32xf32>, vector<32x128xf32>, vector<2x128xf32> -> vector<2x128xf32>
    %215 = arith.addf %213, %214 : vector<2x128xf32>
    %216 = vector.extract_strided_slice %215 {offsets = [0, 0], sizes = [2, 32], strides = [1, 1]} : vector<2x128xf32> to vector<2x32xf32>
    %cst_68 = arith.constant 0.000000e+00 : f32
    %217 = vector.broadcast %cst_68 : f32 to vector<2x32xf32>
    %218 = arith.subf %217, %216 : vector<2x32xf32>
    %219 = math.exp %218 : vector<2x32xf32>
    %cst_69 = arith.constant 1.000000e+00 : f32
    %220 = vector.broadcast %cst_69 : f32 to vector<2x32xf32>
    %221 = arith.addf %220, %219 : vector<2x32xf32>
    %cst_70 = arith.constant 1.000000e+00 : f32
    %222 = vector.broadcast %cst_70 : f32 to vector<2x32xf32>
    %223 = arith.divf %222, %221 : vector<2x32xf32>
    %224 = vector.extract_strided_slice %215 {offsets = [0, 32], sizes = [2, 32], strides = [1, 1]} : vector<2x128xf32> to vector<2x32xf32>
    %cst_71 = arith.constant 0.000000e+00 : f32
    %225 = vector.broadcast %cst_71 : f32 to vector<2x32xf32>
    %226 = arith.subf %225, %224 : vector<2x32xf32>
    %227 = math.exp %226 : vector<2x32xf32>
    %cst_72 = arith.constant 1.000000e+00 : f32
    %228 = vector.broadcast %cst_72 : f32 to vector<2x32xf32>
    %229 = arith.addf %228, %227 : vector<2x32xf32>
    %cst_73 = arith.constant 1.000000e+00 : f32
    %230 = vector.broadcast %cst_73 : f32 to vector<2x32xf32>
    %231 = arith.divf %230, %229 : vector<2x32xf32>
    %232 = vector.extract_strided_slice %215 {offsets = [0, 64], sizes = [2, 32], strides = [1, 1]} : vector<2x128xf32> to vector<2x32xf32>
    %233 = math.tanh %232 : vector<2x32xf32>
    %234 = vector.extract_strided_slice %215 {offsets = [0, 96], sizes = [2, 32], strides = [1, 1]} : vector<2x128xf32> to vector<2x32xf32>
    %cst_74 = arith.constant 0.000000e+00 : f32
    %235 = vector.broadcast %cst_74 : f32 to vector<2x32xf32>
    %236 = arith.subf %235, %234 : vector<2x32xf32>
    %237 = math.exp %236 : vector<2x32xf32>
    %cst_75 = arith.constant 1.000000e+00 : f32
    %238 = vector.broadcast %cst_75 : f32 to vector<2x32xf32>
    %239 = arith.addf %238, %237 : vector<2x32xf32>
    %cst_76 = arith.constant 1.000000e+00 : f32
    %240 = vector.broadcast %cst_76 : f32 to vector<2x32xf32>
    %241 = arith.divf %240, %239 : vector<2x32xf32>
    %242 = arith.mulf %231, %210 : vector<2x32xf32>
    %243 = arith.mulf %223, %233 : vector<2x32xf32>
    %244 = arith.addf %242, %243 : vector<2x32xf32>
    %245 = math.tanh %244 : vector<2x32xf32>
    %246 = arith.mulf %241, %245 : vector<2x32xf32>
    %247 = vector.extract_strided_slice %6 {offsets = [14, 0], sizes = [2, 128], strides = [1, 1]} : vector<16x128xf32> to vector<2x128xf32>
    %cst_77 = arith.constant dense<0.000000e+00> : vector<2x128xf32>
    %248 = tpu.matmul %246, %1, %cst_77 {dimension_numbers = #tpu.dot_dimension_numbers<[1], [0], [0], [1], [0, 0, 1, 1], [], []>} : vector<2x32xf32>, vector<32x128xf32>, vector<2x128xf32> -> vector<2x128xf32>
    %249 = arith.addf %247, %248 : vector<2x128xf32>
    %250 = vector.extract_strided_slice %249 {offsets = [0, 0], sizes = [2, 32], strides = [1, 1]} : vector<2x128xf32> to vector<2x32xf32>
    %cst_78 = arith.constant 0.000000e+00 : f32
    %251 = vector.broadcast %cst_78 : f32 to vector<2x32xf32>
    %252 = arith.subf %251, %250 : vector<2x32xf32>
    %253 = math.exp %252 : vector<2x32xf32>
    %cst_79 = arith.constant 1.000000e+00 : f32
    %254 = vector.broadcast %cst_79 : f32 to vector<2x32xf32>
    %255 = arith.addf %254, %253 : vector<2x32xf32>
    %cst_80 = arith.constant 1.000000e+00 : f32
    %256 = vector.broadcast %cst_80 : f32 to vector<2x32xf32>
    %257 = arith.divf %256, %255 : vector<2x32xf32>
    %258 = vector.extract_strided_slice %249 {offsets = [0, 32], sizes = [2, 32], strides = [1, 1]} : vector<2x128xf32> to vector<2x32xf32>
    %cst_81 = arith.constant 0.000000e+00 : f32
    %259 = vector.broadcast %cst_81 : f32 to vector<2x32xf32>
    %260 = arith.subf %259, %258 : vector<2x32xf32>
    %261 = math.exp %260 : vector<2x32xf32>
    %cst_82 = arith.constant 1.000000e+00 : f32
    %262 = vector.broadcast %cst_82 : f32 to vector<2x32xf32>
    %263 = arith.addf %262, %261 : vector<2x32xf32>
    %cst_83 = arith.constant 1.000000e+00 : f32
    %264 = vector.broadcast %cst_83 : f32 to vector<2x32xf32>
    %265 = arith.divf %264, %263 : vector<2x32xf32>
    %266 = vector.extract_strided_slice %249 {offsets = [0, 64], sizes = [2, 32], strides = [1, 1]} : vector<2x128xf32> to vector<2x32xf32>
    %267 = math.tanh %266 : vector<2x32xf32>
    %268 = vector.extract_strided_slice %249 {offsets = [0, 96], sizes = [2, 32], strides = [1, 1]} : vector<2x128xf32> to vector<2x32xf32>
    %cst_84 = arith.constant 0.000000e+00 : f32
    %269 = vector.broadcast %cst_84 : f32 to vector<2x32xf32>
    %270 = arith.subf %269, %268 : vector<2x32xf32>
    %271 = math.exp %270 : vector<2x32xf32>
    %cst_85 = arith.constant 1.000000e+00 : f32
    %272 = vector.broadcast %cst_85 : f32 to vector<2x32xf32>
    %273 = arith.addf %272, %271 : vector<2x32xf32>
    %cst_86 = arith.constant 1.000000e+00 : f32
    %274 = vector.broadcast %cst_86 : f32 to vector<2x32xf32>
    %275 = arith.divf %274, %273 : vector<2x32xf32>
    %276 = arith.mulf %265, %244 : vector<2x32xf32>
    %277 = arith.mulf %257, %267 : vector<2x32xf32>
    %278 = arith.addf %276, %277 : vector<2x32xf32>
    %279 = math.tanh %278 : vector<2x32xf32>
    %280 = arith.mulf %275, %279 : vector<2x32xf32>
    %281 = tpu.concatenate %280, %278 in 1 : vector<2x32xf32>, vector<2x32xf32> -> vector<2x64xf32>
    %c0_87 = arith.constant 0 : index
    %c0_88 = arith.constant 0 : index
    %282 = vector.load %arg2[%c0_87, %c0_88] : memref<72x4xf32, #tpu.memory_space<vmem>>, vector<64x4xf32>
    %c64 = arith.constant 64 : index
    %c0_89 = arith.constant 0 : index
    %283 = vector.load %arg2[%c64, %c0_89] : memref<72x4xf32, #tpu.memory_space<vmem>>, vector<1x4xf32>
    %cst_90 = arith.constant dense<0.000000e+00> : vector<2x4xf32>
    %284 = tpu.matmul %281, %282, %cst_90 {dimension_numbers = #tpu.dot_dimension_numbers<[1], [0], [0], [1], [0, 0, 1, 1], [], []>} : vector<2x64xf32>, vector<64x4xf32>, vector<2x4xf32> -> vector<2x4xf32>
    %285 = vector.broadcast %283 : vector<1x4xf32> to vector<2x4xf32>
    %286 = arith.addf %284, %285 : vector<2x4xf32>
    %c0_91 = arith.constant 0 : index
    %c0_92 = arith.constant 0 : index
    %287 = vector.load %arg3[%c0_91, %c0_92] : memref<2x4xf32, #tpu.memory_space<vmem>>, vector<2x4xf32>
    tpu.vector_store %arg3[%c0_91, %c0_92], %286 {strides = array<i32>} : memref<2x4xf32, #tpu.memory_space<vmem>>, vector<2x4xf32>,
    return
  }
}

</mosaic_0001>

<bundles_post_ra>
// kernel: tpu_custom_call.1
= control target key start
LH: loop header
LB: loop body
LE: loop exit
PB: predicated region body
PF: predicated region fallthrough
CT: control target
= control target key end

     0   :  { %vm34_vm0 = vcmask 1043456   ;;  %vm27_vm1 = vcmask 31744   ;;  %v1396_v8 = vmov 0.0|0.0   ;;  %s1596_s0 = inlined_call_operand.vmem [shape: f32[16,4], index: 0, kind: input, shape index: {}]   ;;  %s1597_s1 = inlined_call_operand.vmem [shape: f32[48,128], index: 1, kind: input, shape index: {}]   ;;  %s1598_s2 = inlined_call_operand.vmem [shape: f32[72,4], index: 2, kind: input, shape index: {}]   ;;  %s1599_s3 = inlined_call_operand.hbm [shape: f32[2,4], index: 3, kind: output, shape index: {}]  }
   0x1   :  { %v15_v0 = vld [vmem:[%s1597_s1] sm:$0xf]  ;;  %v22_v2 = vld [vmem:[%s1596_s0 + $0x8] sm:$0xff]  ;;  %v17_v4 = vld [vmem:[%s1597_s1 + $0x10] sm:$0xff]  ;;  %1254 = vmatprep.subr.bf16.mxu1 %v1396_v8 }
   0x2   :  { %v21_v1 = vld [vmem:[%s1596_s0] sm:$0xff]  ;;  %1130 = vmatprep.subr.msk.mxu0 %vm34_vm0, %v15_v0  ;;  %v16_v3 = vld [vmem:[%s1597_s1 + $0x8] sm:$0xff]  ;;  %v18_v5 = vld [vmem:[%s1597_s1 + $0x18] sm:$0xff] }
   0x3   :  { %1132 = vmatprep.mubr.msk.f32.mxu0 %vm27_vm1, %v21_v1  ;;  %1131 = vmatpush3.msk.msra.mxu0 %vm34_vm0, %v15_v0  ;;  %v1440_v6 = vpack.c.bf16 %v17_v4, %v16_v3  ;;  %v19_v7 = vld [vmem:[%s1597_s1 + $0x20] sm:$0xff] }
   0x4   :  { %8 = vsyncpa [#allocation3], 0  ;;  %1133 = vmatmul.mubr.msk.f32.vlgmr.msra.gmra.mrb[0].mxu0 %vm27_vm1, %v22_v2  ;;  %1242 = vmatprep.subr.bf16.mxu0 %v1396_v8  ;;  %v1448_v9 = vpack.c.bf16 %v19_v7, %v18_v5  ;;  %vm1397_vm2 = vmmov 0   ;;  %v1398_v10 = vmov 0.0   ;;  %v1065_v11 = vld [vmem:[%s1597_s1 + $0x28] ss:$0 sm:$0xff] }
   0x5   :  { %1244 = vmatpush3.bf16.msra.mxu0 %v1440_v6  ;;  %1143 = vmatprep.mubr.msk.f32.mxu0 %vm1397_vm2, %v1398_v10  ;;  %s1399_s27 = smov 64   ;;  %s1400_s1 = smov 32   ;;  %vm113_vm3 = vcmask 261120   ;;  %vm976_vm4 = vcmask 523264   ;;  %vm1049_vm5 = vcmask 25600  }
   0x6   :  { %1245 = vmatprep.subr.bf16.mxu0 %v1396_v8  ;;  %1256 = vmatpush3.bf16.msra.mxu1 %v1440_v6  ;;  %s1401_s19 = smov [#allocation2]  }
   0x7   :  { %1257 = vmatprep.subr.bf16.mxu1 %v1396_v8  ;;  %1165 = vmatprep.mubr.msk.f32.mxu1 %vm1397_vm2, %v1398_v10  ;;  %s1057_s20 = sshll.u32 %s1401_s19, 4  ;;  %s1058_s20 = int_to_ptr.vmem [resolvable:$true] %s1057_s20 }
   0x8   :  { %s1372_s21 = scalar_lea.vmem %s1058_s20, 32  ;;  %p1377_p1 = scmp.lt.s32.totalorder %s1058_s20, %s1058_s20 }
   0x9   :  { %1247 = vmatpush3.bf16.msra.mxu0 %v1448_v9  ;;  %p1373_p0 = scmp.ne.s32.totalorder %s1058_s20, %s1372_s21  ;;  %p1378_p2 = scmp.lt.s32.totalorder %s1372_s21, %s1372_s21 }
   0xa   :  { %1248 = vmatprep.subr.bf16.mxu0 %v1396_v8  ;;  %1259 = vmatpush3.bf16.msra.mxu1 %v1448_v9 }
   0xb   :  { %1266 = vmatprep.subr.bf16.mxu1 %v1396_v8  ;;  %p1379_p3 = por %p1378_p2, %p1377_p1 }
   0xc   :  { %1144 = vmatmul.mubr.f32.vlgmr.msra.gmra.mrb[2].mxu0 %v1398_v10 }
   0xd   :  { %1250 = vmatpush3.bf16.msra.mxu0 %v1440_v6  ;;  %1154 = vmatprep.mubr.msk.f32.mxu0 %vm1397_vm2, %v1398_v10  ;;  %p1380_p4 = pnand %p1379_p3, %p1373_p0 }
   0xe   :  { %1251 = vmatprep.subr.bf16.mxu0 %v1396_v8 }
  0x11   :  { %1253 = vmatpush3.bf16.msra.mxu0 %v1448_v9 }
  0x12   :  { %1260 = vmatprep.subr.bf16.mxu0 %v1396_v8 }
  0xd7   :  { %v1134_v12 = vpop.f32.mrb[0].mxu0 }
  0xd8   :  { %v1471_v13 = vadd.f32 %v1134_v12, %v1065_v11  ;;  %v104_v14 = vpop.f32.mrb[1].mxu0 }
  0xd9   :  { %v1473_v15 = vadd.f32 %v1065_v11, %v104_v14 }
  0xdf   :  { %v183_v16 = vpop.f32.mrb[2].mxu0 }
  0xe0   :  { %v187_v17 = vadd.f32 %v183_v16, %v1473_v15  ;;  %v1145_v18 = vpop.f32.mrb[3].mxu0 }
  0xe2   :  { %1308 = vtanh.f32 %v187_v17  ;;  %v188_v20 = vsub.f32 0.0, %v187_v17 }
  0xe4   :  { %v189_v21 = vmul.f32 1.442695, %v188_v20 }
  0xe6   :  { %1310 = vpow2.f32 %v189_v21 }
  0xec   :  { %v1309_v19 = vpop.eup %1308 }
  0xed   :  { %197 = vrot.lane.b32.xlu0 %v1309_v19, %s1399_s27 }
  0xf0   :  { %v1311_v22 = vpop.eup %1310 }
  0xf1   :  { %v191_v23 = vadd.f32 1.0, %v1311_v22 }
  0xf3   :  { %1312 = vrcp.f32 %v191_v23 }
  0xfd   :  { %v1313_v24 = vpop.eup %1312 }
  0xfe   :  { %v195_v27 = vmul.f32 0.0, %v1313_v24 }
 0x15f   :  { %v198_v25 = vpop.permute.xlu0 %197 }
 0x160   :  { %v200_v26 = vmul.f32 %v1313_v24, %v198_v25 }
 0x162   :  { %202 = vrot.lane.b32.xlu0 %v200_v26, %s1400_s1 }
 0x1d4   :  { %v203_v28 = vpop.permute.xlu0 %202 }
 0x1d5   :  { %v205_v29 = vadd.f32 %v203_v28, %v195_v27 }
 0x1d7   :  { %1314 = vtanh.f32 %v205_v29  ;;  %v299_v46 = vrot.slane %v205_v29, 6 }
 0x1e1   :  { %v1315_v30 = vpop.eup %1314 }
 0x1e2   :  { %208 = vrot.lane.b32.xlu1 %v1315_v30, %s1399_s27 }
 0x254   :  { %v209_v31 = vpop.permute.xlu1 %208 }
 0x255   :  { %v211_v32 = vmul.f32 %v1313_v24, %v209_v31 }
 0x257   :  { %213 = vrot.lane.b32.xlu1 %v211_v32, %s1400_s1 }
 0x2c9   :  { %v214_v33 = vpop.permute.xlu1 %213 }
 0x2ca   :  { %1155 = vmatmul.mubr.msk.f32.vlgmr.msra.gmra.mrb[4].mxu0 %vm113_vm3, %v214_v33 }
 0x2cb   :  { %1262 = vmatpush3.bf16.msra.mxu0 %v1440_v6  ;;  %1176 = vmatprep.mubr.msk.f32.mxu0 %vm1397_vm2, %v1398_v10 }
 0x2cc   :  { %1263 = vmatprep.subr.bf16.mxu0 %v1396_v8 }
 0x2cf   :  { %1265 = vmatpush3.bf16.msra.mxu0 %v1448_v9 }
 0x2d0   :  { %1272 = vmatprep.subr.bf16.mxu0 %v1396_v8 }
 0x39d   :  { %v283_v34 = vpop.f32.mrb[4].mxu0 }
 0x39e   :  { %v288_v35 = vrot.slane %v283_v34, 6  ;;  %v1156_v36 = vpop.f32.mrb[5].mxu0 }
 0x3a0   :  { %v290_v37 = vadd.f32 %v288_v35, %v1473_v15 }
 0x3a2   :  { %1316 = vtanh.f32 %v290_v37  ;;  %v291_v39 = vsub.f32 0.0, %v290_v37 }
 0x3a4   :  { %v292_v40 = vmul.f32 1.442695, %v291_v39 }
 0x3a6   :  { %1318 = vpow2.f32 %v292_v40 }
 0x3ac   :  { %v1317_v38 = vpop.eup %1316 }
 0x3ad   :  { %303 = vrot.lane.b32.xlu0 %v1317_v38, %s1399_s27 }
 0x3b0   :  { %v1319_v41 = vpop.eup %1318 }
 0x3b1   :  { %v294_v42 = vadd.f32 1.0, %v1319_v41 }
 0x3b3   :  { %1320 = vrcp.f32 %v294_v42 }
 0x3bd   :  { %v1321_v43 = vpop.eup %1320 }
 0x3be   :  { %v301_v47 = vmul.f32 %v1321_v43, %v299_v46 }
 0x41f   :  { %v304_v44 = vpop.permute.xlu0 %303 }
 0x420   :  { %v306_v45 = vmul.f32 %v1321_v43, %v304_v44 }
 0x422   :  { %308 = vrot.lane.b32.xlu1 %v306_v45, %s1400_s1 }
 0x494   :  { %v309_v48 = vpop.permute.xlu1 %308 }
 0x495   :  { %v311_v49 = vadd.f32 %v309_v48, %v301_v47 }
 0x497   :  { %1322 = vtanh.f32 %v311_v49  ;;  %v406_v3 = vrot.slane %v311_v49, 6 }
 0x4a1   :  { %v1323_v50 = vpop.eup %1322 }
 0x4a2   :  { %314 = vrot.lane.b32.xlu0 %v1323_v50, %s1399_s27 }
 0x514   :  { %v315_v51 = vpop.permute.xlu0 %314 }
 0x515   :  { %v317_v52 = vmul.f32 %v1321_v43, %v315_v51 }
 0x517   :  { %v319_v53 = vrot.slane %v317_v52, 2 }
 0x519   :  { %320 = vrot.lane.b32.xlu1 %v319_v53, %s1400_s1 }
 0x58b   :  { %v321_v54 = vpop.permute.xlu1 %320 }
 0x58c   :  { %1166 = vmatmul.mubr.msk.f32.vlgmr.msra.gmra.mrb[0].mxu1 %vm113_vm3, %v321_v54 }
 0x58d   :  { %1268 = vmatpush3.bf16.msra.mxu1 %v1440_v6  ;;  %1187 = vmatprep.mubr.msk.f32.mxu1 %vm1397_vm2, %v1398_v10 }
 0x58e   :  { %1269 = vmatprep.subr.bf16.mxu1 %v1396_v8 }
 0x591   :  { %1271 = vmatpush3.bf16.msra.mxu1 %v1448_v9 }
 0x592   :  { %1278 = vmatprep.subr.bf16.mxu1 %v1396_v8 }
 0x65f   :  { %v390_v55 = vpop.f32.mrb[0].mxu1 }
 0x660   :  { %v395_v56 = vrot.slane %v390_v55, 4  ;;  %v1167_v57 = vpop.f32.mrb[1].mxu1 }
 0x662   :  { %v397_v58 = vadd.f32 %v395_v56, %v1473_v15 }
 0x664   :  { %1324 = vtanh.f32 %v397_v58  ;;  %v398_v60 = vsub.f32 0.0, %v397_v58 }
 0x666   :  { %v399_v61 = vmul.f32 1.442695, %v398_v60 }
 0x668   :  { %1326 = vpow2.f32 %v399_v61 }
 0x66e   :  { %v1325_v59 = vpop.eup %1324 }
 0x66f   :  { %410 = vrot.lane.b32.xlu0 %v1325_v59, %s1399_s27 }
 0x672   :  { %v1327_v62 = vpop.eup %1326 }
 0x673   :  { %v401_v63 = vadd.f32 1.0, %v1327_v62 }
 0x675   :  { %1328 = vrcp.f32 %v401_v63 }
 0x67f   :  { %v1329_v0 = vpop.eup %1328 }
 0x680   :  { %v408_v4 = vmul.f32 %v1329_v0, %v406_v3 }
 0x6e1   :  { %v411_v1 = vpop.permute.xlu0 %410 }
 0x6e2   :  { %v413_v2 = vmul.f32 %v1329_v0, %v411_v1 }
 0x6e4   :  { %415 = vrot.lane.b32.xlu1 %v413_v2, %s1400_s1 }
 0x756   :  { %v416_v5 = vpop.permute.xlu1 %415 }
 0x757   :  { %v418_v7 = vadd.f32 %v416_v5, %v408_v4 }
 0x759   :  { %1330 = vtanh.f32 %v418_v7  ;;  %v513_v30 = vrot.slane %v418_v7, 6 }
 0x763   :  { %v1331_v11 = vpop.eup %1330 }
 0x764   :  { %421 = vrot.lane.b32.xlu0 %v1331_v11, %s1399_s27 }
 0x7d6   :  { %v422_v12 = vpop.permute.xlu0 %421 }
 0x7d7   :  { %v424_v14 = vmul.f32 %v1329_v0, %v422_v12 }
 0x7d9   :  { %v426_v16 = vrot.slane %v424_v14, 4 }
 0x7db   :  { %427 = vrot.lane.b32.xlu1 %v426_v16, %s1400_s1 }
 0x84d   :  { %v428_v17 = vpop.permute.xlu1 %427 }
 0x84e   :  { %1177 = vmatmul.mubr.msk.f32.vlgmr.msra.gmra.mrb[6].mxu0 %vm113_vm3, %v428_v17 }
 0x84f   :  { %1274 = vmatpush3.bf16.msra.mxu0 %v1440_v6  ;;  %1198 = vmatprep.mubr.msk.f32.mxu0 %vm1397_vm2, %v1398_v10 }
 0x850   :  { %1275 = vmatprep.subr.bf16.mxu0 %v1396_v8 }
 0x853   :  { %1277 = vmatpush3.bf16.msra.mxu0 %v1448_v9 }
 0x854   :  { %1284 = vmatprep.subr.bf16.mxu0 %v1396_v8 }
 0x921   :  { %v497_v18 = vpop.f32.mrb[6].mxu0 }
 0x922   :  { %v502_v19 = vrot.slane %v497_v18, 2  ;;  %v1178_v20 = vpop.f32.mrb[7].mxu0 }
 0x924   :  { %v504_v21 = vadd.f32 %v502_v19, %v1473_v15 }
 0x926   :  { %1332 = vtanh.f32 %v504_v21  ;;  %v505_v23 = vsub.f32 0.0, %v504_v21 }
 0x928   :  { %v506_v24 = vmul.f32 1.442695, %v505_v23 }
 0x92a   :  { %1334 = vpow2.f32 %v506_v24 }
 0x930   :  { %v1333_v22 = vpop.eup %1332 }
 0x931   :  { %517 = vrot.lane.b32.xlu0 %v1333_v22, %s1399_s27 }
 0x934   :  { %v1335_v25 = vpop.eup %1334 }
 0x935   :  { %v508_v26 = vadd.f32 1.0, %v1335_v25 }
 0x937   :  { %1336 = vrcp.f32 %v508_v26 }
 0x941   :  { %v1337_v27 = vpop.eup %1336 }
 0x942   :  { %v515_v31 = vmul.f32 %v1337_v27, %v513_v30 }
 0x9a3   :  { %v518_v28 = vpop.permute.xlu0 %517 }
 0x9a4   :  { %v520_v29 = vmul.f32 %v1337_v27, %v518_v28 }
 0x9a6   :  { %522 = vrot.lane.b32.xlu1 %v520_v29, %s1400_s1 }
 0xa18   :  { %v523_v32 = vpop.permute.xlu1 %522 }
 0xa19   :  { %v525_v33 = vadd.f32 %v523_v32, %v515_v31 }
 0xa1b   :  { %1338 = vtanh.f32 %v525_v33  ;;  %v617_v49 = vrot.slane %v525_v33, 6 }
 0xa25   :  { %v1339_v15 = vpop.eup %1338 }
 0xa26   :  { %528 = vrot.lane.b32.xlu0 %v1339_v15, %s1399_s27 }
 0xa98   :  { %v529_v34 = vpop.permute.xlu0 %528 }
 0xa99   :  { %v531_v35 = vmul.f32 %v1337_v27, %v529_v34 }
 0xa9b   :  { %v533_v36 = vrot.slane %v531_v35, 6 }
 0xa9d   :  { %534 = vrot.lane.b32.xlu1 %v533_v36, %s1400_s1 }
 0xb0f   :  { %v535_v37 = vpop.permute.xlu1 %534 }
 0xb10   :  { %1188 = vmatmul.mubr.msk.f32.vlgmr.msra.gmra.mrb[2].mxu1 %vm113_vm3, %v535_v37 }
 0xb11   :  { %1280 = vmatpush3.bf16.msra.mxu1 %v1440_v6  ;;  %1209 = vmatprep.mubr.msk.f32.mxu1 %vm1397_vm2, %v1398_v10 }
 0xb12   :  { %1281 = vmatprep.subr.bf16.mxu1 %v1396_v8 }
 0xb15   :  { %1283 = vmatpush3.bf16.msra.mxu1 %v1448_v9 }
 0xb16   :  { %1290 = vmatprep.subr.bf16.mxu1 %v1396_v8 }
 0xbe3   :  { %v604_v38 = vpop.f32.mrb[2].mxu1 }
 0xbe4   :  { %v608_v39 = vadd.f32 %v604_v38, %v1471_v13  ;;  %v1189_v40 = vpop.f32.mrb[3].mxu1 }
 0xbe6   :  { %1340 = vtanh.f32 %v608_v39  ;;  %v609_v42 = vsub.f32 0.0, %v608_v39 }
 0xbe8   :  { %v610_v43 = vmul.f32 1.442695, %v609_v42 }
 0xbea   :  { %1342 = vpow2.f32 %v610_v43 }
 0xbf0   :  { %v1341_v41 = vpop.eup %1340 }
 0xbf1   :  { %621 = vrot.lane.b32.xlu0 %v1341_v41, %s1399_s27 }
 0xbf4   :  { %v1343_v44 = vpop.eup %1342 }
 0xbf5   :  { %v612_v45 = vadd.f32 1.0, %v1343_v44 }
 0xbf7   :  { %1344 = vrcp.f32 %v612_v45 }
 0xc01   :  { %v1345_v46 = vpop.eup %1344 }
 0xc02   :  { %v619_v50 = vmul.f32 %v1345_v46, %v617_v49 }
 0xc63   :  { %v622_v47 = vpop.permute.xlu0 %621 }
 0xc64   :  { %v624_v48 = vmul.f32 %v1345_v46, %v622_v47 }
 0xc66   :  { %626 = vrot.lane.b32.xlu1 %v624_v48, %s1400_s1 }
 0xcd8   :  { %v627_v51 = vpop.permute.xlu1 %626 }
 0xcd9   :  { %v629_v52 = vadd.f32 %v627_v51, %v619_v50 }
 0xcdb   :  { %1346 = vtanh.f32 %v629_v52 }
 0xce5   :  { %v1347_v53 = vpop.eup %1346 }
 0xce6   :  { %632 = vrot.lane.b32.xlu0 %v1347_v53, %s1399_s27  ;;  %v962_v53 = vld [vmem:[%s1598_s2 + $0x8] sm:$0xff] }
 0xd58   :  { %v633_v54 = vpop.permute.xlu0 %632 }
 0xd59   :  { %v635_v55 = vmul.f32 %v1345_v46, %v633_v54  ;;  %v963_v54 = vld [vmem:[%s1598_s2 + $0x10] sm:$0xff] }
 0xd5b   :  { %637 = vrot.lane.b32.xlu1 %v635_v55, %s1400_s1 }
 0xdcd   :  { %v638_v56 = vpop.permute.xlu1 %637 }
 0xdce   :  { %1199 = vmatmul.mubr.msk.f32.vlgmr.msra.gmra.mrb[8].mxu0 %vm113_vm3, %v638_v56  ;;  %v964_v56 = vld [vmem:[%s1598_s2 + $0x18] sm:$0xff] }
 0xdcf   :  { %1286 = vmatpush3.bf16.msra.mxu0 %v1440_v6  ;;  %1220 = vmatprep.mubr.msk.f32.mxu0 %vm1397_vm2, %v1398_v10 }
 0xdd0   :  { %1287 = vmatprep.subr.bf16.mxu0 %v1396_v8 }
 0xdd3   :  { %1289 = vmatpush3.bf16.msra.mxu0 %v1448_v9  ;;  %v723_v9 = vrot.slane %v629_v52, 6 }
 0xea1   :  { %v707_v57 = vpop.f32.mrb[8].mxu0 }
 0xea2   :  { %v712_v58 = vrot.slane %v707_v57, 6  ;;  %v1200_v59 = vpop.f32.mrb[9].mxu0  ;;  %v1294_v57 = vpack.c.bf16 %v964_v56, %v963_v54 }
 0xea3   :  { %v966_v59 = vld [vmem:[%s1598_s2 + $0x28] sm:$0xff] }
 0xea4   :  { %v714_v60 = vadd.f32 %v712_v58, %v1471_v13  ;;  %v965_v58 = vld [vmem:[%s1598_s2 + $0x20] sm:$0xff] }
 0xea6   :  { %1348 = vtanh.f32 %v714_v60  ;;  %v715_v62 = vsub.f32 0.0, %v714_v60  ;;  %v1297_v60 = vpack.c.bf16 %v966_v59, %v965_v58 }
 0xea8   :  { %v716_v63 = vmul.f32 1.442695, %v715_v62  ;;  %v967_v62 = vld [vmem:[%s1598_s2 + $0x30] sm:$0xff] }
 0xeaa   :  { %1350 = vpow2.f32 %v716_v63  ;;  %v968_v63 = vld [vmem:[%s1598_s2 + $0x38] sm:$0xff] }
 0xeb0   :  { %v1349_v61 = vpop.eup %1348 }
 0xeb1   :  { %727 = vrot.lane.b32.xlu0 %v1349_v61, %s1399_s27 }
 0xeb4   :  { %v1351_v6 = vpop.eup %1350 }
 0xeb5   :  { %v718_v0 = vadd.f32 1.0, %v1351_v6  ;;  %v1300_v6 = vpack.c.bf16 %v968_v63, %v967_v62 }
 0xeb7   :  { %1352 = vrcp.f32 %v718_v0 }
 0xec1   :  { %v1353_v1 = vpop.eup %1352 }
 0xec2   :  { %v725_v4 = vmul.f32 %v1353_v1, %v723_v9 }
 0xf23   :  { %v728_v2 = vpop.permute.xlu0 %727 }
 0xf24   :  { %v730_v3 = vmul.f32 %v1353_v1, %v728_v2 }
 0xf26   :  { %732 = vrot.lane.b32.xlu1 %v730_v3, %s1400_s1 }
 0xf98   :  { %v733_v5 = vpop.permute.xlu1 %732 }
 0xf99   :  { %v735_v7 = vadd.f32 %v733_v5, %v725_v4 }
 0xf9b   :  { %1354 = vtanh.f32 %v735_v7 }
 0xfa5   :  { %v1355_v11 = vpop.eup %1354 }
 0xfa6   :  { %738 = vrot.lane.b32.xlu0 %v1355_v11, %s1399_s27 }
0x1018   :  { %v739_v12 = vpop.permute.xlu0 %738 }
0x1019   :  { %v741_v14 = vmul.f32 %v1353_v1, %v739_v12 }
0x101b   :  { %v743_v16 = vrot.slane %v741_v14, 2 }
0x101d   :  { %744 = vrot.lane.b32.xlu1 %v743_v16, %s1400_s1 }
0x108f   :  { %v745_v17 = vpop.permute.xlu1 %744 }
0x1090   :  { %1210 = vmatmul.mubr.msk.f32.vlgmr.msra.gmra.mrb[4].mxu1 %vm113_vm3, %v745_v17 }
0x1091   :  { %1239 = vmatprep.mubr.msk.f32.mxu1 %vm1397_vm2, %v1398_v10  ;;  %v830_v10 = vrot.slane %v735_v7, 6 }
0x1163   :  { %v814_v18 = vpop.f32.mrb[4].mxu1 }
0x1164   :  { %v819_v19 = vrot.slane %v814_v18, 4  ;;  %v1211_v20 = vpop.f32.mrb[5].mxu1 }
0x1166   :  { %v821_v21 = vadd.f32 %v819_v19, %v1471_v13 }
0x1168   :  { %1356 = vtanh.f32 %v821_v21  ;;  %v822_v23 = vsub.f32 0.0, %v821_v21 }
0x116a   :  { %v823_v24 = vmul.f32 1.442695, %v822_v23 }
0x116c   :  { %1358 = vpow2.f32 %v823_v24 }
0x1172   :  { %v1357_v22 = vpop.eup %1356 }
0x1173   :  { %834 = vrot.lane.b32.xlu0 %v1357_v22, %s1399_s27 }
0x1176   :  { %v1359_v25 = vpop.eup %1358 }
0x1177   :  { %v825_v26 = vadd.f32 1.0, %v1359_v25 }
0x1179   :  { %1360 = vrcp.f32 %v825_v26 }
0x1183   :  { %v1361_v27 = vpop.eup %1360 }
0x1184   :  { %v832_v30 = vmul.f32 %v1361_v27, %v830_v10 }
0x11e5   :  { %v835_v28 = vpop.permute.xlu0 %834 }
0x11e6   :  { %v837_v29 = vmul.f32 %v1361_v27, %v835_v28 }
0x11e8   :  { %839 = vrot.lane.b32.xlu1 %v837_v29, %s1400_s1 }
0x125a   :  { %v840_v31 = vpop.permute.xlu1 %839 }
0x125b   :  { %v842_v32 = vadd.f32 %v840_v31, %v832_v30 }
0x125d   :  { %1362 = vtanh.f32 %v842_v32  ;;  %v937_v49 = vrot.slane %v842_v32, 6 }
0x1267   :  { %v1363_v33 = vpop.eup %1362 }
0x1268   :  { %845 = vrot.lane.b32.xlu0 %v1363_v33, %s1399_s27 }
0x12da   :  { %v846_v15 = vpop.permute.xlu0 %845 }
0x12db   :  { %v848_v34 = vmul.f32 %v1361_v27, %v846_v15 }
0x12dd   :  { %v850_v35 = vrot.slane %v848_v34, 4 }
0x12df   :  { %851 = vrot.lane.b32.xlu1 %v850_v35, %s1400_s1 }
0x1351   :  { %v852_v36 = vpop.permute.xlu1 %851 }
0x1352   :  { %1221 = vmatmul.mubr.msk.f32.vlgmr.msra.gmra.mrb[10].mxu0 %vm113_vm3, %v852_v36 }
0x1425   :  { %v921_v37 = vpop.f32.mrb[10].mxu0 }
0x1426   :  { %v926_v38 = vrot.slane %v921_v37, 2  ;;  %v1222_v39 = vpop.f32.mrb[11].mxu0 }
0x1428   :  { %v928_v40 = vadd.f32 %v926_v38, %v1471_v13  ;;  %v961_v13 = vld [vmem:[%s1598_s2] sm:$0xff] }
0x1429   :  { %v1291_v55 = vpack.c.bf16 %v962_v53, %v961_v13 }
0x142a   :  { %1364 = vtanh.f32 %v928_v40  ;;  %v929_v42 = vsub.f32 0.0, %v928_v40 }
0x142b   :  { %1292 = vmatpush3.bf16.msra.mxu1 %v1291_v55 }
0x142c   :  { %v930_v43 = vmul.f32 1.442695, %v929_v42  ;;  %1293 = vmatprep.subr.bf16.mxu1 %v1396_v8 }
0x142e   :  { %1366 = vpow2.f32 %v930_v43 }
0x142f   :  { %1295 = vmatpush3.bf16.msra.mxu1 %v1294_v57 }
0x1430   :  { %1296 = vmatprep.subr.bf16.mxu1 %v1396_v8 }
0x1433   :  { %1298 = vmatpush3.bf16.msra.mxu1 %v1297_v60 }
0x1434   :  { %v1365_v41 = vpop.eup %1364  ;;  %1299 = vmatprep.subr.bf16.mxu1 %v1396_v8  ;;  %v1076_v8 = vld [vmem:[%s1598_s2 + $0x40] ss:$0 sm:$0xff] }
0x1435   :  { %941 = vrot.lane.b32.xlu0 %v1365_v41, %s1399_s27 }
0x1437   :  { %1301 = vmatpush3.bf16.msra.mxu1 %v1300_v6 }
0x1438   :  { %v1367_v44 = vpop.eup %1366 }
0x1439   :  { %v932_v45 = vadd.f32 1.0, %v1367_v44 }
0x143b   :  { %1368 = vrcp.f32 %v932_v45 }
0x1445   :  { %v1369_v46 = vpop.eup %1368 }
0x1446   :  { %v939_v50 = vmul.f32 %v1369_v46, %v937_v49 }
0x14a7   :  { %v942_v47 = vpop.permute.xlu0 %941 }
0x14a8   :  { %v944_v48 = vmul.f32 %v1369_v46, %v942_v47 }
0x14aa   :  { %946 = vrot.lane.b32.xlu1 %v944_v48, %s1400_s1 }
0x151c   :  { %v947_v51 = vpop.permute.xlu1 %946 }
0x151d   :  { %v949_v52 = vadd.f32 %v947_v51, %v939_v50 }
0x151f   :  { %1370 = vtanh.f32 %v949_v52 }
0x1529   :  { %v1371_v61 = vpop.eup %1370 }
0x152a   :  { %952 = vrot.lane.b32.xlu0 %v1371_v61, %s1399_s27 }
0x159c   :  { %v953_v0 = vpop.permute.xlu0 %952 }
0x159d   :  { %v955_v1 = vmul.f32 %v1369_v46, %v953_v0 }
0x159f   :  { %957 = vrot.lane.b32.xlu1 %v955_v1, %s1400_s1 }
0x1611   :  { %v958_v2 = vpop.permute.xlu1 %957 }
0x1612   :  { %v960_v3 = vsel %vm113_vm3, %v958_v2, %v949_v52 }
0x1613   :  { %v975_v9 = vrot.slane %v960_v3, 6 }
0x1615   :  { %1240 = vmatmul.mubr.msk.f32.vlgmr.msra.gmra.mrb[6].mxu1 %vm976_vm4, %v975_v9 }
0x16e8   :  { %v1045_v4 = vpop.f32.mrb[6].mxu1 }
0x16e9   :  { %v1046_v5 = vadd.f32 %v1076_v8, %v1045_v4  ;;  %v1241_v7 = vpop.f32.mrb[7].mxu1 }
0x16eb   :  { %1050 = vst.msk [vmem:[#allocation2] sm:$0x3] %vm1049_vm5, %v1046_v5 }
0x16ec   :  { %1383 = shalt.err (!%p1380_p4)
}
0x16ed   :  { %s1384_s24 = scalar_lea.hbm %s1599_s3, 32 }
0x16ee   :  { %p1385_p5 = scmp.ne.s32.totalorder %s1599_s3, %s1384_s24  ;;  %p1388_p6 = scmp.lt.u32.totalorder %s1384_s24, %s1599_s3 }
0x16f0   :  { %p1390_p7 = pnand %p1388_p6, %p1385_p5 }
0x16f2   :  { %1393 = shalt.err (!%p1390_p7)
}
0x16f3   :  { %1060 = dma.vmem_to_hbm [thread:$0]  %s1058_s20, 32, %s1599_s3, [#allocation3]  }
0x16f4   :  { %1394 = dma.done.wait [#allocation3], 32  }
0x16f5   :  { %1395 = vsyncadd [#allocation3], 4294967264 }
0x16f6   :  { %1064 = vsyncpa [#allocation3], 1 }

</bundles_post_ra>
